<compile_context>
chip_gen: v5e
topology: v5e:2x2
jax: 0.10.0
libtpu: 0.0.40
codegen_flags: <defaults>
</compile_context>

<pallas_src>
import jax
import jax.numpy as jnp
from jax.experimental import pallas as pl
from jax.experimental.pallas import tpu as pltpu


def _normalize_kernel(scale_ref, bias_ref, img_ref, out_ref):
    # (x - mean) / std  ==  x * (1/std) + (-mean/std)
    x = img_ref[...]                       # (ROWS, COLS)
    s = scale_ref[...]                     # (ROWS, 1) f32, broadcasts over lanes
    b = bias_ref[...]                      # (ROWS, 1) f32
    out_ref[...] = (x * s + b).astype(out_ref.dtype)


def _largest_tile(dim: int, base: int, cap: int) -> int:
    """Largest divisor of `dim` that is a multiple of `base` and <= cap.

    Falls back to the full extent (always a legal BlockSpec block) when `dim`
    is not a multiple of `base`.
    """
    if dim % base != 0:
        return dim
    best = base
    d = base
    limit = min(dim, max(cap, base))
    while d <= limit:
        if dim % d == 0:
            best = d
        d += base
    return best


def normalization(img: jax.Array, mean, std) -> jax.Array:
    """(img - mean[:,None,None]) / std[:,None,None]; img is NCHW."""
    N, C, H, W = img.shape
    mean = jnp.asarray(mean, dtype=jnp.float32).reshape(C)
    std = jnp.asarray(std, dtype=jnp.float32).reshape(C)

    NC, HW = N * C, H * W
    itemsize = jnp.dtype(img.dtype).itemsize
    # Sublane packing: f32 -> 8 rows/vreg, bf16/f16 -> 16, int8/fp8 -> 32.
    row_base = {4: 8, 2: 16, 1: 32}.get(itemsize, 8)

    # ~4 MiB per input tile => 2 in-bufs + 2 out-bufs ~ 16 MiB, safe on
    # v5e (16 MiB default scoped), v6e, and v7x (64 MiB physical VMEM).
    target_tile_bytes = 4 * 1024 * 1024

    col_tile = _largest_tile(
        HW, 128, max(128, target_tile_bytes // (row_base * itemsize)))
    row_cap = max(row_base, target_tile_bytes // max(1, col_tile * itemsize))
    row_tile = _largest_tile(NC, row_base, row_cap)

    # Per-row (row = n*C + c) scale/bias, folded from mean/std in plain JAX.
    scale = 1.0 / std
    bias = -mean * scale
    scale_rows = jnp.tile(scale, N).reshape(NC, 1)
    bias_rows = jnp.tile(bias, N).reshape(NC, 1)

    x2d = img.reshape(NC, HW)
    grid = (pl.cdiv(NC, row_tile), pl.cdiv(HW, col_tile))

    out2d = pl.pallas_call(
        _normalize_kernel,
        out_shape=jax.ShapeDtypeStruct((NC, HW), img.dtype),
        grid=grid,
        in_specs=[
            pl.BlockSpec((row_tile, 1), lambda i, j: (i, 0)),          # scale
            pl.BlockSpec((row_tile, 1), lambda i, j: (i, 0)),          # bias
            pl.BlockSpec((row_tile, col_tile), lambda i, j: (i, j)),   # img
        ],
        out_specs=pl.BlockSpec((row_tile, col_tile), lambda i, j: (i, j)),
        compiler_params=pltpu.CompilerParams(
            dimension_semantics=("parallel", "parallel"),
            vmem_limit_bytes=48 * 1024 * 1024,
        ),
    )(scale_rows, bias_rows, x2d)

    return out2d.reshape(N, C, H, W)


if __name__ == "__main__":
    key = jax.random.PRNGKey(0)

    # Small NCHW input consistent with the module's forward pass.
    N, C, H, W = 2, 4, 16, 16
    mean = jnp.array([0.485, 0.456, 0.406, 0.5], dtype=jnp.float32)
    std = jnp.array([0.229, 0.224, 0.225, 0.25], dtype=jnp.float32)
    x = jax.random.uniform(key, (N, C, H, W), dtype=jnp.float32)

    out = normalization(x, mean, std)
    jax.block_until_ready(out)

    # Reference of the PyTorch semantics. Tolerance slightly relaxed vs 1e-6
    # because the kernel uses the (exact-f32) scale/bias fused form.
    ref = (x - mean[None, :, None, None]) / std[None, :, None, None]
    assert out.shape == x.shape and out.dtype == x.dtype
    assert jnp.allclose(out, ref, atol=1e-5, rtol=1e-5), float(
        jnp.max(jnp.abs(out - ref)))

    print("KERNEL_OK")
</pallas_src>

<mosaic_0001>
module attributes {stable_mosaic.version = 11 : i64} {
  func.func @_normalize_kernel(%arg0: i32, %arg1: i32, %arg2: memref<8x1xf32, #tpu.memory_space<vmem>>, %arg3: memref<8x1xf32, #tpu.memory_space<vmem>>, %arg4: memref<8x256xf32, #tpu.memory_space<vmem>>, %arg5: memref<8x256xf32, #tpu.memory_space<vmem>>) attributes {dimension_semantics = [#tpu.dimension_semantics<parallel>, #tpu.dimension_semantics<parallel>], iteration_bounds = array<i64: 1, 1>, scalar_prefetch = 0 : i64, scratch_operands = 0 : i64, tpu.core_type = #tpu.core_type<tc>, window_params = [{transform_indices = @transform_0, window_bounds = array<i64: 8, 1>}, {transform_indices = @transform_1, window_bounds = array<i64: 8, 1>}, {transform_indices = @transform_2, window_bounds = array<i64: 8, 256>}, {transform_indices = @transform_3, window_bounds = array<i64: 8, 256>}]} {
    %c0 = arith.constant 0 : index
    %c0_0 = arith.constant 0 : index
    %0 = vector.load %arg4[%c0, %c0_0] : memref<8x256xf32, #tpu.memory_space<vmem>>, vector<8x256xf32>
    %c0_1 = arith.constant 0 : index
    %c0_2 = arith.constant 0 : index
    %1 = vector.load %arg2[%c0_1, %c0_2] : memref<8x1xf32, #tpu.memory_space<vmem>>, vector<8x1xf32>
    %c0_3 = arith.constant 0 : index
    %c0_4 = arith.constant 0 : index
    %2 = vector.load %arg3[%c0_3, %c0_4] : memref<8x1xf32, #tpu.memory_space<vmem>>, vector<8x1xf32>
    %3 = vector.broadcast %1 : vector<8x1xf32> to vector<8x256xf32>
    %4 = arith.mulf %0, %3 : vector<8x256xf32>
    %5 = vector.broadcast %2 : vector<8x1xf32> to vector<8x256xf32>
    %6 = arith.addf %4, %5 : vector<8x256xf32>
    %c0_5 = arith.constant 0 : index
    %c0_6 = arith.constant 0 : index
    %7 = vector.load %arg5[%c0_5, %c0_6] : memref<8x256xf32, #tpu.memory_space<vmem>>, vector<8x256xf32>
    tpu.vector_store %arg5[%c0_5, %c0_6], %6 {strides = array<i32>} : memref<8x256xf32, #tpu.memory_space<vmem>>, vector<8x256xf32>,
    return
  }
  func.func @transform_0(%arg0: i32, %arg1: i32) -> (i32, i32) {
    %c0_i32 = arith.constant 0 : i32
    %c0_i32_0 = arith.constant 0 : i32
    return %arg0, %c0_i32 : i32, i32
  }
  func.func @transform_1(%arg0: i32, %arg1: i32) -> (i32, i32) {
    %c0_i32 = arith.constant 0 : i32
    %c0_i32_0 = arith.constant 0 : i32
    return %arg0, %c0_i32 : i32, i32
  }
  func.func @transform_2(%arg0: i32, %arg1: i32) -> (i32, i32) {
    %c0_i32 = arith.constant 0 : i32
    return %arg0, %arg1 : i32, i32
  }
  func.func @transform_3(%arg0: i32, %arg1: i32) -> (i32, i32) {
    %c0_i32 = arith.constant 0 : i32
    return %arg0, %arg1 : i32, i32
  }
}

</mosaic_0001>

<bundles_post_ra>
// kernel: tpu_custom_call.1
= control target key start
LH: loop header
LB: loop body
LE: loop exit
PB: predicated region body
PF: predicated region fallthrough
CT: control target
= control target key end

     0   :  { %s117_s0 = inlined_call_operand.vmem [shape: f32[8,1], index: 0, kind: input, shape index: {}]   ;;  %s118_s1 = inlined_call_operand.vmem [shape: f32[8,1], index: 1, kind: input, shape index: {}]   ;;  %s119_s2 = inlined_call_operand.vmem [shape: f32[8,256], index: 2, kind: input, shape index: {}]   ;;  %s120_s3 = inlined_call_operand.hbm [shape: f32[8,256], index: 3, kind: output, shape index: {}]  }
   0x1   :  { %v17_v0 = vld [vmem:[%s117_s0] sm:$0xff] }
   0x2   :  { %8 = vsyncpa [#allocation3], 0  ;;  %v80_v1 = vmov 0   ;;  %v18_v2 = vld [vmem:[%s118_s1] sm:$0xff]  ;;  %v16_v5 = vld [vmem:[%s119_s2 + $0x8] sm:$0xff]  ;;  %s81_s0 = smov [#allocation2]  }
   0x3   :  { %53 = vset.pattern.permute.xlu0 %v80_v1  ;;  %v15_v4 = vld [vmem:[%s119_s2] sm:$0xff]  ;;  %s40_s20 = sshll.u32 %s81_s0, 4  ;;  %s42_s23 = sshll.u32 %s120_s3, 4  ;;  %s41_s20 = int_to_ptr.vmem [resolvable:$true] %s40_s20  ;;  %s43_s23 = int_to_ptr.hbm [resolvable:$true] %s42_s23 }
   0x4   :  { %21 = vperm.xlu0 %53, %v17_v0  }
   0xc   :  { %28 = vperm.xlu0 %53, %v18_v2  }
  0x76   :  { %v22_v3 = vpop.permute.xlu0 %21 }
  0x77   :  { %v24_v6 = vmul.f32 %v22_v3, %v15_v4  ;;  %v25_v7 = vmul.f32 %v22_v3, %v16_v5 }
  0x7e   :  { %v29_v8 = vpop.permute.xlu0 %28 }
  0x7f   :  { %v31_v9 = vadd.f32 %v29_v8, %v24_v6  ;;  %v32_v10 = vadd.f32 %v29_v8, %v25_v7 }
  0x81   :  { %33 = vst [vmem:[#allocation2] sm:$0xff] %v31_v9 }
  0x82   :  { %34 = vst [vmem:[#allocation2 + $0x8] sm:$0xff] %v32_v10 }
  0x83   :  { %45 = dma.vmem_to_hbm [thread:$0]  %s41_s20, 256, %s43_s23, [#allocation3]  }
  0x84   :  { %78 = dma.done.wait [#allocation3], 256  }
  0x85   :  { %79 = vsyncadd [#allocation3], 4294967040 }
  0x86   :  { %50 = vsyncpa [#allocation3], 1 }

</bundles_post_ra>
